<compile_context>
chip_gen: v6e
topology: v6e:2x2x1
jax: 0.10.0
libtpu: 0.0.40
codegen_flags: <defaults>
</compile_context>

<pallas_src>
import functools

import jax
import jax.numpy as jnp
from jax.experimental import pallas as pl
from jax.experimental.pallas import tpu as pltpu


# ----------------------------- kernel ---------------------------------------
def _speaker_adapter_kernel(x_ref, sb_ref, o_ref, *, eps):
    """Conditional layer norm over the channel (sublane) axis.

    x_ref:  (1, C, TILE_T)  input slab, channels-first
    sb_ref: (1, 2, C, 1)    fused per-batch [scale; bias] (f32, precomputed)
    o_ref:  (1, C, TILE_T)  output slab
    """
    x = x_ref[0].astype(jnp.float32)                         # (C, TILE_T)

    # LayerNorm statistics over the channel axis (sublane reduction, XLU).
    mean = jnp.mean(x, axis=0, keepdims=True)                # (1, TILE_T)
    xc = x - mean                                            # reused below
    var = jnp.mean(xc * xc, axis=0, keepdims=True)           # (1, TILE_T)
    inv_std = jax.lax.rsqrt(var + eps)                       # EUP slot

    # Conditional affine: broadcast (C, 1) scale/bias along the time lanes.
    scale = sb_ref[0, 0]                                     # (C, 1) f32
    bias = sb_ref[0, 1]                                      # (C, 1) f32
    o_ref[0] = (xc * inv_std * scale + bias).astype(o_ref.dtype)


# ----------------------------- tiling helpers --------------------------------
def _cdiv(a, b):
    return (a + b - 1) // b


def _round_up(x, m):
    return _cdiv(x, m) * m


def _choose_tile_t(T, C, B, itemsize, *, vmem_budget_bytes=8 << 20):
    """Largest lane-dense time tile that fits a double-buffered VMEM budget,
    while keeping enough grid steps for pipelining and v7x's two TensorCores."""
    LANE = 128
    t_full = _round_up(T, LANE)

    # Budget: 2 buffers x (input + output) x C x tile_t x itemsize <= budget.
    tile_t = (vmem_budget_bytes // (4 * C * itemsize)) // LANE * LANE
    tile_t = int(min(max(tile_t, LANE), 4096, t_full))

    # Stage 1: keep >= 8 total grid steps for pipelining / megacore, but do not
    # shrink below 512 columns (blocks would drop under the HBM roofline knee).
    while tile_t > 512 and B * _cdiv(t_full, tile_t) < 8:
        tile_t = max(512, (tile_t // 2) // LANE * LANE)
    # Stage 2: guarantee >= 2 steps so both v7x TensorCores get work.
    while tile_t > LANE and B * _cdiv(t_full, tile_t) < 2:
        tile_t = max(LANE, (tile_t // 2) // LANE * LANE)
    return tile_t


# ----------------------------- wrapper ---------------------------------------
def speaker_adapter(x_ncl, speaker_embedding, params, *, eps=1e-5, tile_t=None):
    """SpeakerAdapter forward.

    x_ncl:             (B, C, T)   channels-first, like the PyTorch module
    speaker_embedding: (B, SPK)
    params:
      w_scale (SPK, C), b_scale (C,)   -- nn.Linear weights stored transposed
      w_bias  (SPK, C), b_bias  (C,)
    Returns (B, C, T), same dtype as x_ncl (f32 statistics inside the kernel).
    """
    B, C, T = x_ncl.shape
    itemsize = jnp.dtype(x_ncl.dtype).itemsize

    # ---- Hoisted M=1 linears: one fused (B, SPK) @ (SPK, 2C) XLA matmul ----
    w_fused = jnp.concatenate([params["w_scale"], params["w_bias"]], axis=1)   # (SPK, 2C)
    b_fused = jnp.concatenate([params["b_scale"], params["b_bias"]], axis=0)   # (2C,)
    sb = jnp.dot(speaker_embedding.astype(jnp.float32), w_fused,
                 preferred_element_type=jnp.float32) + b_fused                 # (B, 2C)
    sb = sb.reshape(B, 2, C)[..., None].astype(jnp.float32)                    # (B, 2, C, 1)

    # ---- Lane-dense time tiling under a VMEM budget; pad ragged T ----------
    if tile_t is None:
        tile_t = _choose_tile_t(T, C, B, itemsize)
    else:
        tile_t = max(128, _round_up(int(tile_t), 128))
    T_pad = _round_up(T, tile_t)
    x_p = x_ncl if T_pad == T else jnp.pad(
        x_ncl, ((0, 0), (0, 0), (0, T_pad - T)))

    grid = (B, T_pad // tile_t)   # time innermost: sb block stays VMEM-resident

    kernel = functools.partial(_speaker_adapter_kernel, eps=eps)

    out = pl.pallas_call(
        kernel,
        out_shape=jax.ShapeDtypeStruct((B, C, T_pad), x_ncl.dtype),
        grid_spec=pltpu.PrefetchScalarGridSpec(
            num_scalar_prefetch=0,
            grid=grid,
            in_specs=[
                pl.BlockSpec((1, C, tile_t), lambda b, t: (b, 0, t)),    # x slab
                pl.BlockSpec((1, 2, C, 1), lambda b, t: (b, 0, 0, 0)),   # [scale; bias]
            ],
            out_specs=pl.BlockSpec((1, C, tile_t), lambda b, t: (b, 0, t)),
        ),
        compiler_params=pltpu.CompilerParams(
            # Both axes fully independent -> shard across v7x's 2 TCs.
            # TODO(synk): verify megacore split in a trace; fall back to
            # pltpu.CORE_PARALLEL on the leading axis if needed.
            dimension_semantics=("parallel", "parallel"),
            # Covers v5e's 16 MiB scoped default; well inside v7x's 64 MiB.
            vmem_limit_bytes=32 * 1024 * 1024,
        ),
    )(x_p, sb)

    return out if T_pad == T else out[:, :, :T]


# ----------------------------- reference (plain JAX) -------------------------
def reference(x_ncl, spk, p, *, eps=1e-5):
    xt = jnp.transpose(x_ncl.astype(jnp.float32), (0, 2, 1))  # (B, T, C)
    mean = xt.mean(-1, keepdims=True)
    var = ((xt - mean) ** 2).mean(-1, keepdims=True)
    y = (xt - mean) / jnp.sqrt(var + eps)
    scale = spk.astype(jnp.float32) @ p["w_scale"] + p["b_scale"]   # (B, C)
    bias = spk.astype(jnp.float32) @ p["w_bias"] + p["b_bias"]      # (B, C)
    y = y * scale[:, None, :] + bias[:, None, :]
    return jnp.transpose(y, (0, 2, 1)).astype(x_ncl.dtype)          # (B, C, T)


# ----------------------------- params ----------------------------------------
def init_params(key, C, SPK):
    # NOTE: the PyTorch module initializes W_scale.weight=0, W_scale.bias=1,
    # W_bias.weight=0, W_bias.bias=0.  We use small random values here so the
    # correctness check actually exercises the conditional affine path.
    ks = jax.random.split(key, 2)
    f32 = jnp.float32
    return {
        "w_scale": jax.random.normal(ks[0], (SPK, C), f32) * 0.02,
        "b_scale": jnp.ones((C,), f32),
        "w_bias": jax.random.normal(ks[1], (SPK, C), f32) * 0.02,
        "b_bias": jnp.zeros((C,), f32),
    }


def _run_case(key, B, C, T, SPK, tile_t=None):
    k_x, k_s, k_p = jax.random.split(key, 3)
    x = jax.random.normal(k_x, (B, C, T), jnp.float32)       # PyTorch NCL layout
    spk = jax.random.normal(k_s, (B, SPK), jnp.float32)
    params = init_params(k_p, C, SPK)

    out = speaker_adapter(x, spk, params, tile_t=tile_t)
    out = jax.block_until_ready(out)
    out_ref = reference(x, spk, params)

    assert out.shape == (B, C, T)
    err = float(jnp.max(jnp.abs(out - out_ref)))
    assert jnp.allclose(out, out_ref, atol=1e-4, rtol=1e-4), err
    return err


# ----------------------------- main -------------------------------------------
if __name__ == "__main__":
    key = jax.random.PRNGKey(0)
    k1, k2 = jax.random.split(key, 2)

    # Case 1: small module-like shapes with a ragged T (exercises padding +
    # lane-dense store path;  T=200 -> padded to 256).
    _run_case(k1, B=2, C=64, T=200, SPK=32)

    # Case 2: explicit small tile_t to exercise a multi-step time grid
    # (grid = (2, 4)) and the per-batch-resident scale/bias block.
    _run_case(k2, B=2, C=128, T=512, SPK=64, tile_t=128)

    print("KERNEL_OK")
</pallas_src>

<mosaic_0001>
module attributes {stable_mosaic.version = 11 : i64} {
  func.func @_speaker_adapter_kernel(%arg0: i32, %arg1: i32, %arg2: memref<1x64x256xf32, #tpu.memory_space<vmem>>, %arg3: memref<1x2x64x1xf32, #tpu.memory_space<vmem>>, %arg4: memref<1x64x256xf32, #tpu.memory_space<vmem>>) attributes {dimension_semantics = [#tpu.dimension_semantics<parallel>, #tpu.dimension_semantics<parallel>], iteration_bounds = array<i64: 2, 1>, scalar_prefetch = 0 : i64, scratch_operands = 0 : i64, tpu.core_type = #tpu.core_type<tc>, window_params = [{transform_indices = @transform_0, window_bounds = array<i64: 1, 64, 256>}, {transform_indices = @transform_1, window_bounds = array<i64: 1, 2, 64, 1>}, {transform_indices = @transform_2, window_bounds = array<i64: 1, 64, 256>}]} {
    %c0 = arith.constant 0 : index
    %c0_0 = arith.constant 0 : index
    %c0_1 = arith.constant 0 : index
    %0 = vector.load %arg2[%c0, %c0_0, %c0_1] : memref<1x64x256xf32, #tpu.memory_space<vmem>>, vector<1x64x256xf32>
    %1 = vector.shape_cast %0 : vector<1x64x256xf32> to vector<64x256xf32>
    %cst = arith.constant dense<0.000000e+00> : vector<256xf32>
    %2 = vector.multi_reduction <add>, %1, %cst [0] : vector<64x256xf32> to vector<256xf32>
    %3 = vector.shape_cast %2 : vector<256xf32> to vector<1x256xf32>
    %cst_2 = arith.constant 6.400000e+01 : f32
    %4 = vector.broadcast %cst_2 : f32 to vector<1x256xf32>
    %5 = arith.divf %3, %4 : vector<1x256xf32>
    %6 = vector.broadcast %5 : vector<1x256xf32> to vector<64x256xf32>
    %7 = arith.subf %1, %6 : vector<64x256xf32>
    %8 = arith.mulf %7, %7 : vector<64x256xf32>
    %cst_3 = arith.constant dense<0.000000e+00> : vector<256xf32>
    %9 = vector.multi_reduction <add>, %8, %cst_3 [0] : vector<64x256xf32> to vector<256xf32>
    %10 = vector.shape_cast %9 : vector<256xf32> to vector<1x256xf32>
    %cst_4 = arith.constant 6.400000e+01 : f32
    %11 = vector.broadcast %cst_4 : f32 to vector<1x256xf32>
    %12 = arith.divf %10, %11 : vector<1x256xf32>
    %cst_5 = arith.constant 9.99999974E-6 : f32
    %13 = vector.broadcast %cst_5 : f32 to vector<1x256xf32>
    %14 = arith.addf %12, %13 : vector<1x256xf32>
    %15 = math.rsqrt %14 : vector<1x256xf32>
    %c0_6 = arith.constant 0 : index
    %c0_7 = arith.constant 0 : index
    %c0_8 = arith.constant 0 : index
    %c0_9 = arith.constant 0 : index
    %16 = vector.load %arg3[%c0_6, %c0_7, %c0_8, %c0_9] : memref<1x2x64x1xf32, #tpu.memory_space<vmem>>, vector<1x1x64x1xf32>
    %17 = vector.shape_cast %16 : vector<1x1x64x1xf32> to vector<64x1xf32>
    %c0_10 = arith.constant 0 : index
    %c1 = arith.constant 1 : index
    %c0_11 = arith.constant 0 : index
    %c0_12 = arith.constant 0 : index
    %18 = vector.load %arg3[%c0_10, %c1, %c0_11, %c0_12] : memref<1x2x64x1xf32, #tpu.memory_space<vmem>>, vector<1x1x64x1xf32>
    %19 = vector.shape_cast %18 : vector<1x1x64x1xf32> to vector<64x1xf32>
    %20 = vector.broadcast %15 : vector<1x256xf32> to vector<64x256xf32>
    %21 = arith.mulf %7, %20 : vector<64x256xf32>
    %22 = vector.broadcast %17 : vector<64x1xf32> to vector<64x256xf32>
    %23 = arith.mulf %21, %22 : vector<64x256xf32>
    %24 = vector.broadcast %19 : vector<64x1xf32> to vector<64x256xf32>
    %25 = arith.addf %23, %24 : vector<64x256xf32>
    %c0_13 = arith.constant 0 : index
    %c0_14 = arith.constant 0 : index
    %c0_15 = arith.constant 0 : index
    %26 = vector.load %arg4[%c0_13, %c0_14, %c0_15] : memref<1x64x256xf32, #tpu.memory_space<vmem>>, vector<1x64x256xf32>
    %27 = vector.shape_cast %26 : vector<1x64x256xf32> to vector<64x256xf32>
    %28 = vector.shape_cast %25 : vector<64x256xf32> to vector<1x64x256xf32>
    tpu.vector_store %arg4[%c0_13, %c0_14, %c0_15], %28 {strides = array<i32>} : memref<1x64x256xf32, #tpu.memory_space<vmem>>, vector<1x64x256xf32>,
    return
  }
  func.func @transform_0(%arg0: i32, %arg1: i32) -> (i32, i32, i32) {
    %c0_i32 = arith.constant 0 : i32
    %c0_i32_0 = arith.constant 0 : i32
    return %arg0, %c0_i32, %arg1 : i32, i32, i32
  }
  func.func @transform_1(%arg0: i32, %arg1: i32) -> (i32, i32, i32, i32) {
    %c0_i32 = arith.constant 0 : i32
    %c0_i32_0 = arith.constant 0 : i32
    %c0_i32_1 = arith.constant 0 : i32
    %c0_i32_2 = arith.constant 0 : i32
    return %arg0, %c0_i32, %c0_i32_0, %c0_i32_1 : i32, i32, i32, i32
  }
  func.func @transform_2(%arg0: i32, %arg1: i32) -> (i32, i32, i32) {
    %c0_i32 = arith.constant 0 : i32
    %c0_i32_0 = arith.constant 0 : i32
    return %arg0, %c0_i32, %arg1 : i32, i32, i32
  }
}

</mosaic_0001>

<bundles_post_ra>
// kernel: tpu_custom_call.1
= control target key start
LH: loop header
LB: loop body
LE: loop exit
PB: predicated region body
PF: predicated region fallthrough
CT: control target
= control target key end

     0   :  { %7 = vsyncpa [#allocation3], 0  ;;  %s1077_s0 = inlined_call_operand.vmem [shape: f32[2,64,256], index: 0, kind: input, shape index: {}]   ;;  %s1078_s1 = inlined_call_operand.vmem [shape: f32[2,2,64,1], index: 1, kind: input, shape index: {}]   ;;  %s1079_s2 = inlined_call_operand.hbm [shape: f32[2,64,256], index: 2, kind: output, shape index: {}]  }
   0x1   :  { %9 = vsyncpa [#allocation3 + $0x1], 0  ;;  %s757_s9 = smov 0   ;;  %s759_s10 = smov 0  }
   0x2   :  { %s761_s11 = smov 0   ;;  %s763_s12 = smov 0  }
   0x3   :  { %s765_s13 = smov 0   ;;  %s767_s14 = smov 0  }
   0x4 LB: > { %s570_s15 = sadd.s32 4294967295, %s736_s14   ;;  %s571_s16 = sadd.s32 4294967294, %s736_s14   ;;  %s736_s14 = sphi %s767_s14, %s15_s14   ;;  %s732_s13 = sphi %s765_s13, %s1086_s13   ;;  %s728_s12 = sphi %s763_s12, %s1085_s12   ;;  %s724_s11 = sphi %s761_s11, %s1084_s11   ;;  %s720_s10 = sphi %s759_s10, %s1083_s10   ;;  %s716_s9 = sphi %s757_s9, %s1082_s9  }
   0x5   : > { %s27_s17 = sadd.s32 1, %s732_s13  ;;  %s90_s18 = sadd.s32 1, %s724_s11 }
   0x6   : > { %p29_p0 = scmp.ge.s32.totalorder %s27_s17, 2  ;;  %p100_p1 = scmp.ne.s32.totalorder %s724_s11, %s720_s10 }
   0x7   : > { %p101_p2 = scmp.eq.s32.totalorder %s570_s15, 1  ;;  %p106_p3 = scmp.ne.s32.totalorder %s720_s10, %s716_s9 }
   0x8   : > { %s1088_s17 = smov (%p29_p0, %s27_s17), 0  ;;  %p107_p5 = scmp.eq.s32.totalorder %s571_s16, 1 }
   0x9   : > { %p797_p4 = por %p101_p2, %p100_p1  ;;  %s85_s20 = ssub.s32 %s732_s13, %s1088_s17 }
   0xa   : > { %p574_p6 = scmp.ge.s32.totalorder %s736_s14, 1  ;;  %p88_p7 = scmp.eq.s32.totalorder %s85_s20, 0 }
   0xb   : > { %p804_p8 = por %p107_p5, %p106_p3  ;;  %p146_p9 = scmp.lt.s32.totalorder %s736_s14, 3 }
   0xc   : > { %s810_s22 = scalar_select %p88_p7, %s724_s11, %s90_s18  }
   0xd   : > { %p147_p10 = pnand %p574_p6, %p146_p9 }
   0xe   : > { %p178_p11 = scmp.lt.s32.totalorder (!%p147_p10), %s728_s12, 1  ;;  %s174_s3 = sand.u32 (!%p147_p10), 1, %s720_s10  }
   0xf   : > { %150 = sbr.rel (%p147_p10) target bundleno = 194 (0xc2), region = 28  ;;  %s575_s4 = sshll.u32 (!%p147_p10), %s174_s3, 7 }
  0x10   : > { %s999_s5 = scalar_lea.vmem (!%p147_p10), [#allocation2], %s575_s4  ;;  %s595_s6 = sshll.u32 (!%p147_p10), %s728_s12, 11 }
  0x11   : > { %s479_s7 = sshll.u32 (!%p147_p10), %s999_s5, 4  ;;  %s1032_s16 = scalar_lea.sflag (!%p147_p10), [#allocation3], %s174_s3  ;;  %s1024_s7 = int_to_ptr.vmem [resolvable:$true] %s479_s7 }
  0x12   : > { %s660_s18 = scalar_lea.vmem (!%p147_p10), %s1024_s7, 2048  ;;  %s739_s20 = smov (!%p147_p10), [#allocation2]  }
  0x13   : > { %p661_p12 = scmp.ne.s32.totalorder (!%p147_p10), %s1024_s7, %s660_s18 }
  0x14   : > { %v738_v0 = vmov 0   ;;  %s179_s23 = scalar_select %p178_p11, %s728_s12, 1 }
  0x15   : > { %655 = vset.pattern.permute.xlu1 %v738_v0  ;;  %654 = vset.pattern.permute.xlu0 %v738_v0  ;;  %s1022_s12 = scalar_lea.hbm %s1079_s2, %s595_s6  ;;  %p662_p13 = pnand %p661_p12, %p797_p4 }
  0x16   : > { %s593_s24 = sshll.u32 %s179_s23, 7  ;;  %s664_s23 = sshll.u32 %s739_s20, 4  ;;  %s665_s23 = int_to_ptr.vmem [resolvable:$false] %s664_s23 }
  0x17   : > { %s817_s27 = scalar_lea.vmem %s1078_s1, %s593_s24  ;;  %s824_s30 = scalar_lea.vmem %s1077_s0, %s593_s24 }
  0x18   : > { %v304_v1 = vld [vmem:[%s817_s27 + $0x10] sm:$0xff]  ;;  %v302_v2 = vld [vmem:[%s817_s27] sm:$0xff]  ;;  %v305_v3 = vld [vmem:[%s817_s27 + $0x18] sm:$0xff]  ;;  %p663_p0 = pneg %p662_p13  ;;  %s666_s24 = scalar_lea.vmem %s665_s23, 4096 }
  0x19   : > { %347 = vperm.xlu1 %655, %v304_v1   ;;  %337 = vperm.xlu0 %654, %v302_v2   ;;  %v303_v4 = vld [vmem:[%s817_s27 + $0x8] sm:$0xff]  ;;  %v306_v6 = vld [vmem:[%s817_s27 + $0x20] sm:$0xff]  ;;  %v837_v9 = vld [vmem:[%s824_s30 + $0x10] sm:$0xff]  ;;  %p667_p1 = scmp.lt.s32.totalorder %s1024_s7, %s665_s23  ;;  %p668_p2 = scmp.lt.s32.totalorder %s666_s24, %s660_s18 }
  0x1a   : > { %v307_v5 = vld [vmem:[%s817_s27 + $0x28] sm:$0xff]  ;;  %v831_v7 = vld [vmem:[%s824_s30] sm:$0xff]  ;;  %v840_v10 = vld [vmem:[%s824_s30 + $0x18] sm:$0xff] }
  0x1b   : > { %v834_v8 = vld [vmem:[%s824_s30 + $0x8] sm:$0xff]  ;;  %v843_v11 = vld [vmem:[%s824_s30 + $0x20] sm:$0xff]  ;;  %v209_v13 = vadd.f32 %v837_v9, %v831_v7  ;;  %v853_v15 = vld [vmem:[%s824_s30 + $0x30] sm:$0xff]  ;;  %p669_p3 = por %p668_p2, %p667_p1 }
  0x1c   : > { %v846_v12 = vld [vmem:[%s824_s30 + $0x28] sm:$0xff]  ;;  %v222_v14 = vadd.f32 %v840_v10, %v834_v8  ;;  %v856_v16 = vld [vmem:[%s824_s30 + $0x38] sm:$0xff]  ;;  %v308_v20 = vld [vmem:[%s817_s27 + $0x30] sm:$0xff] }
  0x1d   : > { %352 = vperm.xlu1 %655, %v305_v3   ;;  %342 = vperm.xlu0 %654, %v303_v4   ;;  %v309_v17 = vld [vmem:[%s817_s27 + $0x38] sm:$0xff]  ;;  %v210_v18 = vadd.f32 %v209_v13, %v843_v11  ;;  %v863_v21 = vld [vmem:[%s824_s30 + $0x40] sm:$0xff]  ;;  %v866_v22 = vld [vmem:[%s824_s30 + $0x48] sm:$0xff]  ;;  %p670_p5 = pnand %p669_p3, %p663_p0 }
  0x1e   : > { %v223_v19 = vadd.f32 %v222_v14, %v846_v12  ;;  %v871_v25 = vld [vmem:[%s824_s30 + $0x50] sm:$0xff]  ;;  %v874_v26 = vld [vmem:[%s824_s30 + $0x58] sm:$0xff]  ;;  %v581_v27 = vld [vmem:[%s817_s27 + $0x48] sm:$0xff] }
  0x1f   : > { %v211_v23 = vadd.f32 %v210_v18, %v853_v15  ;;  %v580_v30 = vld [vmem:[%s817_s27 + $0x40] sm:$0xff]  ;;  %v884_v32 = vld [vmem:[%s824_s30 + $0x68] sm:$0xff]  ;;  %v889_v35 = vld [vmem:[%s824_s30 + $0x70] sm:$0xff] }
  0x20   : > { %v224_v24 = vadd.f32 %v223_v19, %v856_v16  ;;  %v881_v31 = vld [vmem:[%s824_s30 + $0x60] sm:$0xff]  ;;  %v892_v36 = vld [vmem:[%s824_s30 + $0x78] sm:$0xff]  ;;  %v582_v40 = vld [vmem:[%s817_s27 + $0x50] sm:$0xff] }
  0x21   : > { %362 = vperm.xlu1 %655, %v307_v5   ;;  %357 = vperm.xlu0 %654, %v306_v6   ;;  %v212_v28 = vadd.f32 %v211_v23, %v863_v21  ;;  %v583_v39 = vld [vmem:[%s817_s27 + $0x58] sm:$0xff]  ;;  %v585_v43 = vld [vmem:[%s817_s27 + $0x68] sm:$0xff]  ;;  %v584_v44 = vld [vmem:[%s817_s27 + $0x60] sm:$0xff] }
  0x22   : > { %v225_v29 = vadd.f32 %v224_v24, %v866_v22  ;;  %v587_v47 = vld [vmem:[%s817_s27 + $0x78] sm:$0xff]  ;;  %v586_v48 = vld [vmem:[%s817_s27 + $0x70] sm:$0xff] }
  0x23   : > { %v213_v33 = vadd.f32 %v212_v28, %v871_v25 }
  0x24   : > { %v226_v34 = vadd.f32 %v225_v29, %v874_v26 }
  0x25   : > { %372 = vperm.xlu1 %655, %v309_v17   ;;  %367 = vperm.xlu0 %654, %v308_v20   ;;  %v214_v37 = vadd.f32 %v213_v33, %v881_v31 }
  0x26   : > { %v227_v38 = vadd.f32 %v226_v34, %v884_v32 }
  0x27   : > { %v215_v41 = vadd.f32 %v214_v37, %v889_v35 }
  0x28   : > { %v228_v42 = vadd.f32 %v227_v38, %v892_v36 }
  0x29   : > { %398 = vperm.xlu1 %655, %v581_v27   ;;  %393 = vperm.xlu0 %654, %v580_v30   ;;  %v216_v45 = vrot.slane %v215_v41, 4 }
  0x2a   : > { %v229_v46 = vrot.slane %v228_v42, 4 }
  0x2b   : > { %v217_v49 = vadd.f32 %v216_v45, %v215_v41 }
  0x2c   : > { %v230_v50 = vadd.f32 %v229_v46, %v228_v42 }
  0x2d   : > { %408 = vperm.xlu1 %655, %v583_v39   ;;  %403 = vperm.xlu0 %654, %v582_v40   ;;  %v218_v51 = vrot.slane %v217_v49, 2 }
  0x2e   : > { %v231_v52 = vrot.slane %v230_v50, 2 }
  0x2f   : > { %v219_v53 = vadd.f32 %v218_v51, %v217_v49 }
  0x30   : > { %v232_v54 = vadd.f32 %v231_v52, %v230_v50 }
  0x31   : > { %418 = vperm.xlu1 %655, %v585_v43   ;;  %413 = vperm.xlu0 %654, %v584_v44   ;;  %v220_v55 = vrot.slane %v219_v53, 1 }
  0x32   : > { %v233_v56 = vrot.slane %v232_v54, 1 }
  0x33   : > { %v221_v57 = vadd.f32 %v220_v55, %v219_v53 }
  0x34   : > { %v234_v58 = vadd.f32 %v233_v56, %v232_v54 }
  0x35   : > { %428 = vperm.xlu1 %655, %v587_v47   ;;  %423 = vperm.xlu0 %654, %v586_v48   ;;  %v236_v59 = vmul.f32 0.015625, %v221_v57 }
  0x36   : > { %v237_v60 = vmul.f32 0.015625, %v234_v58 }
  0x37   : > { %v905_v61 = vsub.f32 %v831_v7, %v236_v59  ;;  %v908_v62 = vsub.f32 %v837_v9, %v236_v59  ;;  %v917_v1 = vsub.f32 %v843_v11, %v236_v59  ;;  %v931_v7 = vsub.f32 %v853_v15, %v236_v59 }
  0x38   : > { %v911_v63 = vsub.f32 %v834_v8, %v237_v60  ;;  %v914_v0 = vsub.f32 %v840_v10, %v237_v60  ;;  %v924_v4 = vsub.f32 %v846_v12, %v237_v60  ;;  %v936_v10 = vsub.f32 %v856_v16, %v237_v60 }
  0x39   : > { %v254_v2 = vmul.f32 %v905_v61, %v905_v61  ;;  %v256_v3 = vmul.f32 %v908_v62, %v908_v62  ;;  %v258_v8 = vmul.f32 %v917_v1, %v917_v1  ;;  %v941_v13 = vsub.f32 %v863_v21, %v236_v59 }
  0x3a   : > { %v255_v5 = vmul.f32 %v911_v63, %v911_v63  ;;  %v257_v6 = vmul.f32 %v914_v0, %v914_v0  ;;  %v259_v11 = vmul.f32 %v924_v4, %v924_v4  ;;  %v260_v14 = vmul.f32 %v931_v7, %v931_v7 }
  0x3b   : > { %v270_v9 = vadd.f32 %v256_v3, %v254_v2  ;;  %v946_v15 = vsub.f32 %v866_v22, %v237_v60  ;;  %v261_v18 = vmul.f32 %v936_v10, %v936_v10  ;;  %v951_v16 = vsub.f32 %v871_v25, %v236_v59 }
  0x3c   : > { %v283_v12 = vadd.f32 %v257_v6, %v255_v5  ;;  %v262_v20 = vmul.f32 %v941_v13, %v941_v13  ;;  %v956_v21 = vsub.f32 %v874_v26, %v237_v60  ;;  %v961_v22 = vsub.f32 %v881_v31, %v236_v59 }
  0x3d   : > { %v271_v17 = vadd.f32 %v270_v9, %v258_v8  ;;  %v263_v24 = vmul.f32 %v946_v15, %v946_v15  ;;  %v264_v28 = vmul.f32 %v951_v16, %v951_v16  ;;  %v966_v25 = vsub.f32 %v884_v32, %v237_v60 }
  0x3e   : > { %v284_v19 = vadd.f32 %v283_v12, %v259_v11  ;;  %v265_v30 = vmul.f32 %v956_v21, %v956_v21  ;;  %v971_v26 = vsub.f32 %v889_v35, %v236_v59  ;;  %v266_v34 = vmul.f32 %v961_v22, %v961_v22 }
  0x3f   : > { %v272_v23 = vadd.f32 %v271_v17, %v260_v14  ;;  %v976_v31 = vsub.f32 %v892_v36, %v237_v60  ;;  %v267_v38 = vmul.f32 %v966_v25, %v966_v25 }
  0x40   : > { %v285_v27 = vadd.f32 %v284_v19, %v261_v18  ;;  %v268_v32 = vmul.f32 %v971_v26, %v971_v26 }
  0x41   : > { %v273_v29 = vadd.f32 %v272_v23, %v262_v20  ;;  %v269_v41 = vmul.f32 %v976_v31, %v976_v31 }
  0x42   : > { %v286_v33 = vadd.f32 %v285_v27, %v263_v24 }
  0x43   : > { %v274_v37 = vadd.f32 %v273_v29, %v264_v28 }
  0x44   : > { %v287_v39 = vadd.f32 %v286_v33, %v265_v30 }
  0x45   : > { %v275_v40 = vadd.f32 %v274_v37, %v266_v34 }
  0x46   : > { %v288_v35 = vadd.f32 %v287_v39, %v267_v38 }
  0x47   : > { %v276_v42 = vadd.f32 %v275_v40, %v268_v32 }
  0x48   : > { %v289_v43 = vadd.f32 %v288_v35, %v269_v41 }
  0x49   : > { %v277_v44 = vrot.slane %v276_v42, 4 }
  0x4a   : > { %v290_v45 = vrot.slane %v289_v43, 4 }
  0x4b   : > { %v278_v46 = vadd.f32 %v277_v44, %v276_v42 }
  0x4c   : > { %v291_v47 = vadd.f32 %v290_v45, %v289_v43 }
  0x4d   : > { %v279_v36 = vrot.slane %v278_v46, 2 }
  0x4e   : > { %v292_v48 = vrot.slane %v291_v47, 2 }
  0x4f   : > { %v280_v49 = vadd.f32 %v279_v36, %v278_v46 }
  0x50   : > { %v293_v50 = vadd.f32 %v292_v48, %v291_v47 }
  0x51   : > { %v281_v51 = vrot.slane %v280_v49, 1 }
  0x52   : > { %v294_v52 = vrot.slane %v293_v50, 1 }
  0x53   : > { %v282_v53 = vadd.f32 %v281_v51, %v280_v49 }
  0x54   : > { %v295_v54 = vadd.f32 %v294_v52, %v293_v50 }
  0x55   : > { %v296_v55 = vmul.f32 0.015625, %v282_v53 }
  0x56   : > { %v297_v56 = vmul.f32 0.015625, %v295_v54 }
  0x57   : > { %v298_v57 = vadd.f32 1e-05, %v296_v55 }
  0x58   : > { %v299_v58 = vadd.f32 1e-05, %v297_v56 }
  0x59   : > { %656 = vrsqrt.f32 %v298_v57 }
  0x5a   : > { %658 = vrsqrt.f32 %v299_v58 }
  0x66   : > { %v657_v5 = vpop.eup %656 }
  0x67   : > { %v659_v6 = vpop.eup %658  ;;  %v319_v11 = vmul.f32 %v657_v5, %v905_v61  ;;  %v321_v14 = vmul.f32 %v657_v5, %v908_v62  ;;  %v323_v20 = vmul.f32 %v657_v5, %v917_v1  ;;  %v325_v24 = vmul.f32 %v657_v5, %v931_v7 }
  0x68   : > { %v320_v12 = vmul.f32 %v659_v6, %v911_v63  ;;  %v322_v17 = vmul.f32 %v659_v6, %v914_v0  ;;  %v324_v23 = vmul.f32 %v659_v6, %v924_v4  ;;  %v326_v27 = vmul.f32 %v659_v6, %v936_v10 }
  0x69   : > { %v329_v38 = vmul.f32 %v657_v5, %v951_v16  ;;  %v330_v1 = vmul.f32 %v659_v6, %v956_v21  ;;  %v327_v4 = vmul.f32 %v657_v5, %v941_v13  ;;  %v328_v7 = vmul.f32 %v659_v6, %v946_v15 }
  0x6a   : > { %v333_v42 = vmul.f32 %v657_v5, %v971_v26  ;;  %v334_v43 = vmul.f32 %v659_v6, %v976_v31  ;;  %v331_v44 = vmul.f32 %v657_v5, %v961_v22  ;;  %v332_v45 = vmul.f32 %v659_v6, %v966_v25 }
  0x94   : > { %v348_v59 = vpop.permute.xlu1 %347  ;;  %v338_v60 = vpop.permute.xlu0 %337 }
  0x95   : > { %v375_v28 = vmul.f32 %v338_v60, %v319_v11  ;;  %v376_v61 = vmul.f32 %v338_v60, %v320_v12  ;;  %v379_v39 = vmul.f32 %v348_v59, %v323_v20  ;;  %v380_v10 = vmul.f32 %v348_v59, %v324_v23 }
  0x98   : > { %v353_v2 = vpop.permute.xlu1 %352  ;;  %v343_v3 = vpop.permute.xlu0 %342 }
  0x99   : > { %v377_v29 = vmul.f32 %v343_v3, %v321_v14  ;;  %v378_v63 = vmul.f32 %v343_v3, %v322_v17  ;;  %v381_v32 = vmul.f32 %v353_v2, %v325_v24  ;;  %v382_v40 = vmul.f32 %v353_v2, %v326_v27 }
  0x9c   : > { %v363_v8 = vpop.permute.xlu1 %362  ;;  %v358_v9 = vpop.permute.xlu0 %357 }
  0x9d   : > { %v385_v46 = vmul.f32 %v363_v8, %v329_v38  ;;  %v386_v47 = vmul.f32 %v363_v8, %v330_v1  ;;  %v383_v36 = vmul.f32 %v358_v9, %v327_v4  ;;  %v384_v48 = vmul.f32 %v358_v9, %v328_v7 }
  0xa0   : > { %v373_v18 = vpop.permute.xlu1 %372  ;;  %v368_v19 = vpop.permute.xlu0 %367 }
  0xa1   : > { %v389_v25 = vmul.f32 %v373_v18, %v333_v42  ;;  %v390_v52 = vmul.f32 %v373_v18, %v334_v43  ;;  %v387_v53 = vmul.f32 %v368_v19, %v331_v44  ;;  %v388_v54 = vmul.f32 %v368_v19, %v332_v45 }
  0xa4   : > { %v399_v30 = vpop.permute.xlu1 %398  ;;  %v394_v62 = vpop.permute.xlu0 %393 }
  0xa5   : > { %v433_v33 = vadd.f32 %v399_v30, %v377_v29  ;;  %v434_v0 = vadd.f32 %v399_v30, %v378_v63  ;;  %v431_v34 = vadd.f32 %v394_v62, %v375_v28  ;;  %v432_v37 = vadd.f32 %v394_v62, %v376_v61 }
  0xa7   : > { %449 = vst [vmem:[%s999_s5 + $0x10] sm:$0xff] %v433_v33  ;;  %450 = vst [vmem:[%s999_s5 + $0x18] sm:$0xff] %v434_v0 }
  0xa8   : > { %447 = vst [vmem:[%s999_s5] sm:$0xff] %v431_v34  ;;  %448 = vst [vmem:[%s999_s5 + $0x8] sm:$0xff] %v432_v37  ;;  %v409_v16 = vpop.permute.xlu1 %408  ;;  %v404_v13 = vpop.permute.xlu0 %403 }
  0xa9   : > { %v437_v15 = vadd.f32 %v409_v16, %v381_v32  ;;  %v438_v21 = vadd.f32 %v409_v16, %v382_v40  ;;  %v435_v41 = vadd.f32 %v404_v13, %v379_v39  ;;  %v436_v35 = vadd.f32 %v404_v13, %v380_v10 }
  0xab   : > { %453 = vst [vmem:[%s999_s5 + $0x30] sm:$0xff] %v437_v15  ;;  %454 = vst [vmem:[%s999_s5 + $0x38] sm:$0xff] %v438_v21 }
  0xac   : > { %451 = vst [vmem:[%s999_s5 + $0x20] sm:$0xff] %v435_v41  ;;  %452 = vst [vmem:[%s999_s5 + $0x28] sm:$0xff] %v436_v35  ;;  %v419_v26 = vpop.permute.xlu1 %418  ;;  %v414_v31 = vpop.permute.xlu0 %413 }
  0xad   : > { %v441_v49 = vadd.f32 %v419_v26, %v385_v46  ;;  %v442_v22 = vadd.f32 %v419_v26, %v386_v47  ;;  %v439_v50 = vadd.f32 %v414_v31, %v383_v36  ;;  %v440_v51 = vadd.f32 %v414_v31, %v384_v48 }
  0xaf   : > { %457 = vst [vmem:[%s999_s5 + $0x50] sm:$0xff] %v441_v49  ;;  %458 = vst [vmem:[%s999_s5 + $0x58] sm:$0xff] %v442_v22 }
  0xb0   : > { %455 = vst [vmem:[%s999_s5 + $0x40] sm:$0xff] %v439_v50  ;;  %456 = vst [vmem:[%s999_s5 + $0x48] sm:$0xff] %v440_v51  ;;  %v429_v55 = vpop.permute.xlu1 %428  ;;  %v424_v56 = vpop.permute.xlu0 %423 }
  0xb1   : > { %v445_v57 = vadd.f32 %v429_v55, %v389_v25  ;;  %v446_v58 = vadd.f32 %v429_v55, %v390_v52  ;;  %v443_v59 = vadd.f32 %v424_v56, %v387_v53  ;;  %v444_v60 = vadd.f32 %v424_v56, %v388_v54 }
  0xb3   : > { %461 = vst [vmem:[%s999_s5 + $0x70] sm:$0xff] %v445_v57  ;;  %462 = vst [vmem:[%s999_s5 + $0x78] sm:$0xff] %v446_v58 }
  0xb4   : > { %459 = vst [vmem:[%s999_s5 + $0x60] sm:$0xff] %v443_v59  ;;  %460 = vst [vmem:[%s999_s5 + $0x68] sm:$0xff] %v444_v60 }
  0xb5   : > { %673 = shalt.err (!%p670_p5)
}
  0xb6   : > { %s674_s25 = scalar_lea.hbm %s1022_s12, 2048  ;;  %s678_s28 = scalar_lea.hbm %s1079_s2, 4096 }
  0xb7   : > { %p675_p6 = scmp.ne.s32.totalorder %s1022_s12, %s674_s25  ;;  %p679_p10 = scmp.lt.s32.totalorder %s1022_s12, %s1079_s2 }
  0xb8   : > { %p680_p11 = scmp.lt.s32.totalorder %s678_s28, %s674_s25 }
  0xb9   : > { %p676_p7 = pnand %p675_p6, %p797_p4 }
  0xba   : > { %p681_p12 = por %p680_p11, %p679_p10 }
  0xbb   : > { %p677_p9 = pneg %p676_p7 }
  0xbd   : > { %p682_p13 = pnand %p681_p12, %p677_p9 }
  0xbf   : > { %685 = shalt.err (!%p682_p13)
}
  0xc0   : > { %s740_s3 = smov 256   ;;  %s741_s4 = smov 16  }
  0xc1   : > { %596 = dma.vmem_to_hbm [thread:$0]  (%p797_p4), %s1024_s7, 2048, %s1022_s12, %s1032_s16, %s740_s3, %s740_s3, %s741_s4  }
  0xc2 PF: > { %p602_p0 = scmp.ge.s32.totalorder %s736_s14, 2  ;;  %s494_s5 = sand.u32 1, %s716_s9  }
  0xc3   : > { %s495_s6 = scalar_lea.sflag [#allocation3], %s494_s5 }
  0xc4   : > { %p599_p1 = pnand %p602_p0, %p804_p8 }
  0xc6   : > { %p600_p2 = pneg %p599_p1 }
  0xc8   : > { %711 = dma.done.wait (%p600_p2), %s495_s6, 2048  }
  0xc9   : > { %713 = vsyncadd (%p600_p2), %s495_s6, 4294965248  ;;  %s15_s14 = sadd.s32 1, %s736_s14   ;;  %s1082_s9 = smov %s720_s10 }
  0xca   : > { %p12_p3 = scmp.ge.s32.totalorder %s15_s14, 4   ;;  %s1083_s10 = smov %s724_s11 }
  0xcb   : > { %s1084_s11 = smov %s810_s22  ;;  %s1085_s12 = smov %s732_s13 }
  0xcc   : > { %s1086_s13 = smov %s1088_s17  ;;  %14 = sbr.rel (!%p12_p3) target bundleno = 4 (0x4), region = 67 }
  0xd1   :  { %500 = vsyncpa [#allocation3], 1 }
  0xd2   :  { %502 = vsyncpa [#allocation3 + $0x1], 1 }

</bundles_post_ra>
